<compile_context>
chip_gen: v6e
topology: v6e:2x2x1
jax: 0.10.0
libtpu: 0.0.40
codegen_flags: <defaults>
</compile_context>

<pallas_src>
import functools

import jax
import jax.numpy as jnp
from jax.experimental import pallas as pl
from jax.experimental.pallas import tpu as pltpu

_BN_EPS = 1e-5
_LANE = 128


# ----------------------------- Pallas kernels ------------------------------ #

def _conv_kernel(mode):
    """Fused matmul + BN-shift + residual + ReLU epilogue (f32 accumulate/epilogue)."""
    if mode == "plain":
        def kernel(p_ref, w_ref, b_ref, o_ref):
            y = jnp.dot(p_ref[...], w_ref[...],
                        preferred_element_type=jnp.float32) + b_ref[...]
            o_ref[...] = jnp.maximum(y, 0.0).astype(o_ref.dtype)
    elif mode == "identity":
        def kernel(p_ref, w_ref, b_ref, r_ref, o_ref):
            y = jnp.dot(p_ref[...], w_ref[...],
                        preferred_element_type=jnp.float32) + b_ref[...]
            o_ref[...] = jnp.maximum(y + r_ref[...], 0.0).astype(o_ref.dtype)
    else:  # "downsample": fused 1x1-conv + bn3 residual path
        def kernel(p_ref, w_ref, b_ref, q_ref, v_ref, c_ref, o_ref):
            y = jnp.dot(p_ref[...], w_ref[...],
                        preferred_element_type=jnp.float32) + b_ref[...]
            r = jnp.dot(q_ref[...], v_ref[...],
                        preferred_element_type=jnp.float32) + c_ref[...]
            o_ref[...] = jnp.maximum(y + r, 0.0).astype(o_ref.dtype)
    return kernel


def _round_up(x, m):
    return (x + m - 1) // m * m


def _pad2(a, rows, cols, dtype):
    out = jnp.zeros((rows, cols), dtype)
    return out.at[: a.shape[0], : a.shape[1]].set(a.astype(dtype))


def conv_bn_act_pallas(p, w, bias, residual=None, res_p=None, res_w=None,
                       res_bias=None, tm=512):
    """out = relu(p @ w + bias [+ residual | + res_p @ res_w + res_bias]).

    p: (M, K) f32 patches; w: (K, C) f32 with BN scale already folded in;
    bias: (C,) f32 BN shift.  Matmul operands are cast to bf16, accumulation
    and epilogue are f32.  Tiled over M; weights stay VMEM-resident.
    """
    M, K = p.shape
    C = w.shape[1]
    Kp = _round_up(K, _LANE)
    Cp = _round_up(C, _LANE)
    TM = min(tm, _round_up(M, _LANE))
    Mp = _round_up(M, TM)

    p_pad = _pad2(p, Mp, Kp, jnp.bfloat16)
    w_pad = _pad2(w, Kp, Cp, jnp.bfloat16)
    b_pad = _pad2(bias.reshape(1, C), 1, Cp, jnp.float32)

    inputs = [p_pad, w_pad, b_pad]
    in_specs = [
        pl.BlockSpec((TM, Kp), lambda i: (i, 0)),
        pl.BlockSpec((Kp, Cp), lambda i: (0, 0)),   # constant index -> VMEM-resident
        pl.BlockSpec((1, Cp), lambda i: (0, 0)),
    ]
    flops = 2 * Mp * Kp * Cp
    bytes_accessed = Mp * Kp * 2 + Kp * Cp * 2 + Cp * 4 + Mp * Cp * 4

    if residual is not None:
        mode = "identity"
        inputs.append(_pad2(residual, Mp, Cp, jnp.float32))
        in_specs.append(pl.BlockSpec((TM, Cp), lambda i: (i, 0)))
        bytes_accessed += Mp * Cp * 4
    elif res_p is not None:
        mode = "downsample"
        K3 = res_p.shape[1]
        K3p = _round_up(K3, _LANE)
        inputs += [
            _pad2(res_p, Mp, K3p, jnp.bfloat16),
            _pad2(res_w, K3p, Cp, jnp.bfloat16),
            _pad2(res_bias.reshape(1, C), 1, Cp, jnp.float32),
        ]
        in_specs += [
            pl.BlockSpec((TM, K3p), lambda i: (i, 0)),
            pl.BlockSpec((K3p, Cp), lambda i: (0, 0)),
            pl.BlockSpec((1, Cp), lambda i: (0, 0)),
        ]
        flops += 2 * Mp * K3p * Cp
        bytes_accessed += Mp * K3p * 2 + K3p * Cp * 2 + Cp * 4
    else:
        mode = "plain"

    out = pl.pallas_call(
        _conv_kernel(mode),
        out_shape=jax.ShapeDtypeStruct((Mp, Cp), jnp.float32),
        grid=(Mp // TM,),
        in_specs=in_specs,
        out_specs=pl.BlockSpec((TM, Cp), lambda i: (i, 0)),
        compiler_params=pltpu.CompilerParams(
            dimension_semantics=("parallel",),   # megacore sharding on v7x
        ),
        cost_estimate=pl.CostEstimate(
            flops=flops, transcendentals=0, bytes_accessed=bytes_accessed),
    )(*inputs)
    return out[:M, :C]


# ------------------------------- glue (JAX) -------------------------------- #

def _im2col(x_nhwc, k, stride, pad):
    """x: (N,H,W,C) -> (N*Ho*Wo, k*k*C) with (kh, kw, c) feature ordering."""
    N, H, W, C = x_nhwc.shape
    xp = jnp.pad(x_nhwc, ((0, 0), (pad, pad), (pad, pad), (0, 0)))
    Hp, Wp = H + 2 * pad, W + 2 * pad
    Ho = (Hp - k) // stride + 1
    Wo = (Wp - k) // stride + 1
    cols = []
    for kh in range(k):
        for kw in range(k):
            cols.append(xp[:, kh:kh + stride * (Ho - 1) + 1:stride,
                           kw:kw + stride * (Wo - 1) + 1:stride, :])
    patches = jnp.concatenate(cols, axis=-1)  # (N, Ho, Wo, k*k*C)
    return patches.reshape(N * Ho * Wo, k * k * C), Ho, Wo


def _w_to_mat(w_oihw):
    """(Cout, Cin, kh, kw) -> (kh*kw*Cin, Cout), matching _im2col ordering."""
    Cout = w_oihw.shape[0]
    return jnp.transpose(w_oihw, (2, 3, 1, 0)).reshape(-1, Cout)


def _fold_conv_bn(w_oihw, gamma, beta, mean, var):
    """Fold inference-mode BN into the weight matrix (scale) + a bias (shift)."""
    scale = gamma / jnp.sqrt(var + _BN_EPS)
    shift = beta - mean * scale
    w_mat = _w_to_mat(w_oihw) * scale[None, :]
    return w_mat, shift


def block_forward(x_nchw, params, in_channels, out_channels, stride):
    x = jnp.transpose(x_nchw, (0, 2, 3, 1)).astype(jnp.float32)  # NHWC
    N, H, W, Cin = x.shape

    w1, b1 = _fold_conv_bn(params["w1"], params["g1"], params["b1"],
                           params["m1"], params["v1"])
    w2, b2 = _fold_conv_bn(params["w2"], params["g2"], params["b2"],
                           params["m2"], params["v2"])

    # --- conv1 (3x3, stride, pad=1) + bn1 + relu ---
    p1, Ho, Wo = _im2col(x, 3, stride, 1)
    out1 = conv_bn_act_pallas(p1, w1, b1).reshape(N, Ho, Wo, out_channels)

    # --- conv2 (3x3, s=1, pad=1) + bn2 + residual add + relu (fully fused) ---
    p2, _, _ = _im2col(out1, 3, 1, 1)
    if in_channels != out_channels or stride > 1:
        # residual = bn3(conv3(x)) fused into the same kernel (1x1, stride).
        w3, b3 = _fold_conv_bn(params["w3"], params["g3"], params["b3"],
                               params["m3"], params["v3"])
        p3 = x[:, ::stride, ::stride, :].reshape(N * Ho * Wo, Cin)
        out_flat = conv_bn_act_pallas(p2, w2, b2, res_p=p3, res_w=w3, res_bias=b3)
    else:
        residual = x.reshape(N * H * W, Cin)
        out_flat = conv_bn_act_pallas(p2, w2, b2, residual=residual)

    out = out_flat.reshape(N, Ho, Wo, out_channels)
    return jnp.transpose(out, (0, 3, 1, 2))  # back to NCHW


# ------------------------- pure-JAX reference check ------------------------ #

def _ref_forward(x, params, in_channels, out_channels, stride):
    def conv(y, w, s, pad):
        return jax.lax.conv_general_dilated(
            y, w, (s, s), ((pad, pad), (pad, pad)),
            dimension_numbers=("NCHW", "OIHW", "NCHW"))

    def bn(y, g, b, m, v):
        g, b, m, v = (a[None, :, None, None] for a in (g, b, m, v))
        return (y - m) / jnp.sqrt(v + _BN_EPS) * g + b

    out1 = jax.nn.relu(bn(conv(x, params["w1"], stride, 1),
                          params["g1"], params["b1"], params["m1"], params["v1"]))
    out1 = bn(conv(out1, params["w2"], 1, 1),
              params["g2"], params["b2"], params["m2"], params["v2"])
    if in_channels != out_channels or stride > 1:
        res = bn(conv(x, params["w3"], stride, 0),
                 params["g3"], params["b3"], params["m3"], params["v3"])
    else:
        res = x
    return jax.nn.relu(out1 + res)


# ---------------------------------- main ----------------------------------- #

if __name__ == "__main__":
    key = jax.random.PRNGKey(0)

    def make_params(k, cin, cout):
        ks = jax.random.split(k, 15)
        normal = lambda kk, s: jax.random.normal(kk, s, jnp.float32)
        return {
            "w1": 0.1 * normal(ks[0], (cout, cin, 3, 3)),
            "g1": 1.0 + 0.1 * normal(ks[1], (cout,)),
            "b1": 0.1 * normal(ks[2], (cout,)),
            "m1": 0.1 * normal(ks[3], (cout,)),
            "v1": 0.5 + jnp.abs(normal(ks[4], (cout,))),
            "w2": 0.1 * normal(ks[5], (cout, cout, 3, 3)),
            "g2": 1.0 + 0.1 * normal(ks[6], (cout,)),
            "b2": 0.1 * normal(ks[7], (cout,)),
            "m2": 0.1 * normal(ks[8], (cout,)),
            "v2": 0.5 + jnp.abs(normal(ks[9], (cout,))),
            "w3": 0.1 * normal(ks[10], (cout, cin, 1, 1)),
            "g3": 1.0 + 0.1 * normal(ks[11], (cout,)),
            "b3": 0.1 * normal(ks[12], (cout,)),
            "m3": 0.1 * normal(ks[13], (cout,)),
            "v3": 0.5 + jnp.abs(normal(ks[14], (cout,))),
        }

    k1, k2, k3, k4 = jax.random.split(key, 4)
    TOL = 2e-2  # bf16 MXU operands (f32 accumulate) vs f32 reference

    # --- config A: downsample path (Cin != Cout, stride 2) ---
    N, Cin, H, W, Cout, stride = 2, 4, 16, 16, 8, 2
    params_a = make_params(k1, Cin, Cout)
    x_a = jax.random.normal(k2, (N, Cin, H, W), jnp.float32)
    fwd_a = jax.jit(functools.partial(block_forward, in_channels=Cin,
                                      out_channels=Cout, stride=stride))
    out_a = jax.block_until_ready(fwd_a(x_a, params_a))
    ref_a = _ref_forward(x_a, params_a, Cin, Cout, stride)
    assert out_a.shape == ref_a.shape == (N, Cout, H // stride, W // stride)
    err_a = float(jnp.max(jnp.abs(out_a - ref_a)))
    assert jnp.allclose(out_a, ref_a, atol=TOL, rtol=TOL), err_a

    # --- config B: identity residual (Cin == Cout, stride 1) ---
    Cb = 8
    params_b = make_params(k3, Cb, Cb)
    x_b = jax.random.normal(k4, (N, Cb, H, W), jnp.float32)
    fwd_b = jax.jit(functools.partial(block_forward, in_channels=Cb,
                                      out_channels=Cb, stride=1))
    out_b = jax.block_until_ready(fwd_b(x_b, params_b))
    ref_b = _ref_forward(x_b, params_b, Cb, Cb, 1)
    assert out_b.shape == ref_b.shape == (N, Cb, H, W)
    err_b = float(jnp.max(jnp.abs(out_b - ref_b)))
    assert jnp.allclose(out_b, ref_b, atol=TOL, rtol=TOL), err_b

    print("KERNEL_OK")
</pallas_src>

<mosaic_0001>
module attributes {stable_mosaic.version = 11 : i64} {
  func.func @kernel(%arg0: i32, %arg1: memref<128x128xbf16, #tpu.memory_space<vmem>>, %arg2: memref<128x128xbf16, #tpu.memory_space<vmem>>, %arg3: memref<1x128xf32, #tpu.memory_space<vmem>>, %arg4: memref<128x128xf32, #tpu.memory_space<vmem>>) attributes {dimension_semantics = [#tpu.dimension_semantics<parallel>], iteration_bounds = array<i64: 1>, scalar_prefetch = 0 : i64, scratch_operands = 0 : i64, tpu.core_type = #tpu.core_type<tc>, window_params = [{transform_indices = @transform_0, window_bounds = array<i64: 128, 128>}, {pipeline_mode = #tpu.pipeline_mode<synchronous>, transform_indices = @transform_1, window_bounds = array<i64: 128, 128>}, {pipeline_mode = #tpu.pipeline_mode<synchronous>, transform_indices = @transform_2, window_bounds = array<i64: 1, 128>}, {transform_indices = @transform_3, window_bounds = array<i64: 128, 128>}]} {
    %c0 = arith.constant 0 : index
    %c0_0 = arith.constant 0 : index
    %0 = vector.load %arg1[%c0, %c0_0] : memref<128x128xbf16, #tpu.memory_space<vmem>>, vector<128x128xbf16>
    %c0_1 = arith.constant 0 : index
    %c0_2 = arith.constant 0 : index
    %1 = vector.load %arg2[%c0_1, %c0_2] : memref<128x128xbf16, #tpu.memory_space<vmem>>, vector<128x128xbf16>
    %cst = arith.constant dense<0.000000e+00> : vector<128x128xf32>
    %2 = tpu.matmul %0, %1, %cst {dimension_numbers = #tpu.dot_dimension_numbers<[1], [0], [0], [1], [0, 0, 1, 1], [], []>} : vector<128x128xbf16>, vector<128x128xbf16>, vector<128x128xf32> -> vector<128x128xf32>
    %c0_3 = arith.constant 0 : index
    %c0_4 = arith.constant 0 : index
    %3 = vector.load %arg3[%c0_3, %c0_4] : memref<1x128xf32, #tpu.memory_space<vmem>>, vector<1x128xf32>
    %4 = vector.broadcast %3 : vector<1x128xf32> to vector<128x128xf32>
    %5 = arith.addf %2, %4 : vector<128x128xf32>
    %cst_5 = arith.constant 0.000000e+00 : f32
    %6 = vector.broadcast %cst_5 : f32 to vector<128x128xf32>
    %7 = arith.maximumf %5, %6 : vector<128x128xf32>
    %c0_6 = arith.constant 0 : index
    %c0_7 = arith.constant 0 : index
    %8 = vector.load %arg4[%c0_6, %c0_7] : memref<128x128xf32, #tpu.memory_space<vmem>>, vector<128x128xf32>
    tpu.vector_store %arg4[%c0_6, %c0_7], %7 {strides = array<i32>} : memref<128x128xf32, #tpu.memory_space<vmem>>, vector<128x128xf32>,
    return
  }
  func.func @transform_0(%arg0: i32) -> (i32, i32) {
    %c0_i32 = arith.constant 0 : i32
    %c0_i32_0 = arith.constant 0 : i32
    return %arg0, %c0_i32 : i32, i32
  }
  func.func @transform_1(%arg0: i32) -> (i32, i32) {
    %c0_i32 = arith.constant 0 : i32
    %c0_i32_0 = arith.constant 0 : i32
    %c0_i32_1 = arith.constant 0 : i32
    return %c0_i32, %c0_i32_0 : i32, i32
  }
  func.func @transform_2(%arg0: i32) -> (i32, i32) {
    %c0_i32 = arith.constant 0 : i32
    %c0_i32_0 = arith.constant 0 : i32
    %c0_i32_1 = arith.constant 0 : i32
    return %c0_i32, %c0_i32_0 : i32, i32
  }
  func.func @transform_3(%arg0: i32) -> (i32, i32) {
    %c0_i32 = arith.constant 0 : i32
    %c0_i32_0 = arith.constant 0 : i32
    return %arg0, %c0_i32 : i32, i32
  }
}

module attributes {stable_mosaic.version = 11 : i64} {
  func.func @kernel(%arg0: i32, %arg1: memref<128x128xbf16, #tpu.memory_space<vmem>>, %arg2: memref<128x128xbf16, #tpu.memory_space<vmem>>, %arg3: memref<1x128xf32, #tpu.memory_space<vmem>>, %arg4: memref<128x128xbf16, #tpu.memory_space<vmem>>, %arg5: memref<128x128xbf16, #tpu.memory_space<vmem>>, %arg6: memref<1x128xf32, #tpu.memory_space<vmem>>, %arg7: memref<128x128xf32, #tpu.memory_space<vmem>>) attributes {dimension_semantics = [#tpu.dimension_semantics<parallel>], iteration_bounds = array<i64: 1>, scalar_prefetch = 0 : i64, scratch_operands = 0 : i64, tpu.core_type = #tpu.core_type<tc>, window_params = [{transform_indices = @transform_0, window_bounds = array<i64: 128, 128>}, {pipeline_mode = #tpu.pipeline_mode<synchronous>, transform_indices = @transform_1, window_bounds = array<i64: 128, 128>}, {pipeline_mode = #tpu.pipeline_mode<synchronous>, transform_indices = @transform_2, window_bounds = array<i64: 1, 128>}, {transform_indices = @transform_3, window_bounds = array<i64: 128, 128>}, {pipeline_mode = #tpu.pipeline_mode<synchronous>, transform_indices = @transform_4, window_bounds = array<i64: 128, 128>}, {pipeline_mode = #tpu.pipeline_mode<synchronous>, transform_indices = @transform_5, window_bounds = array<i64: 1, 128>}, {transform_indices = @transform_6, window_bounds = array<i64: 128, 128>}]} {
    %c0 = arith.constant 0 : index
    %c0_0 = arith.constant 0 : index
    %0 = vector.load %arg1[%c0, %c0_0] : memref<128x128xbf16, #tpu.memory_space<vmem>>, vector<128x128xbf16>
    %c0_1 = arith.constant 0 : index
    %c0_2 = arith.constant 0 : index
    %1 = vector.load %arg2[%c0_1, %c0_2] : memref<128x128xbf16, #tpu.memory_space<vmem>>, vector<128x128xbf16>
    %cst = arith.constant dense<0.000000e+00> : vector<128x128xf32>
    %2 = tpu.matmul %0, %1, %cst {dimension_numbers = #tpu.dot_dimension_numbers<[1], [0], [0], [1], [0, 0, 1, 1], [], []>} : vector<128x128xbf16>, vector<128x128xbf16>, vector<128x128xf32> -> vector<128x128xf32>
    %c0_3 = arith.constant 0 : index
    %c0_4 = arith.constant 0 : index
    %3 = vector.load %arg3[%c0_3, %c0_4] : memref<1x128xf32, #tpu.memory_space<vmem>>, vector<1x128xf32>
    %4 = vector.broadcast %3 : vector<1x128xf32> to vector<128x128xf32>
    %5 = arith.addf %2, %4 : vector<128x128xf32>
    %c0_5 = arith.constant 0 : index
    %c0_6 = arith.constant 0 : index
    %6 = vector.load %arg4[%c0_5, %c0_6] : memref<128x128xbf16, #tpu.memory_space<vmem>>, vector<128x128xbf16>
    %c0_7 = arith.constant 0 : index
    %c0_8 = arith.constant 0 : index
    %7 = vector.load %arg5[%c0_7, %c0_8] : memref<128x128xbf16, #tpu.memory_space<vmem>>, vector<128x128xbf16>
    %cst_9 = arith.constant dense<0.000000e+00> : vector<128x128xf32>
    %8 = tpu.matmul %6, %7, %cst_9 {dimension_numbers = #tpu.dot_dimension_numbers<[1], [0], [0], [1], [0, 0, 1, 1], [], []>} : vector<128x128xbf16>, vector<128x128xbf16>, vector<128x128xf32> -> vector<128x128xf32>
    %c0_10 = arith.constant 0 : index
    %c0_11 = arith.constant 0 : index
    %9 = vector.load %arg6[%c0_10, %c0_11] : memref<1x128xf32, #tpu.memory_space<vmem>>, vector<1x128xf32>
    %10 = vector.broadcast %9 : vector<1x128xf32> to vector<128x128xf32>
    %11 = arith.addf %8, %10 : vector<128x128xf32>
    %12 = arith.addf %5, %11 : vector<128x128xf32>
    %cst_12 = arith.constant 0.000000e+00 : f32
    %13 = vector.broadcast %cst_12 : f32 to vector<128x128xf32>
    %14 = arith.maximumf %12, %13 : vector<128x128xf32>
    %c0_13 = arith.constant 0 : index
    %c0_14 = arith.constant 0 : index
    %15 = vector.load %arg7[%c0_13, %c0_14] : memref<128x128xf32, #tpu.memory_space<vmem>>, vector<128x128xf32>
    tpu.vector_store %arg7[%c0_13, %c0_14], %14 {strides = array<i32>} : memref<128x128xf32, #tpu.memory_space<vmem>>, vector<128x128xf32>,
    return
  }
  func.func @transform_0(%arg0: i32) -> (i32, i32) {
    %c0_i32 = arith.constant 0 : i32
    %c0_i32_0 = arith.constant 0 : i32
    return %arg0, %c0_i32 : i32, i32
  }
  func.func @transform_1(%arg0: i32) -> (i32, i32) {
    %c0_i32 = arith.constant 0 : i32
    %c0_i32_0 = arith.constant 0 : i32
    %c0_i32_1 = arith.constant 0 : i32
    return %c0_i32, %c0_i32_0 : i32, i32
  }
  func.func @transform_2(%arg0: i32) -> (i32, i32) {
    %c0_i32 = arith.constant 0 : i32
    %c0_i32_0 = arith.constant 0 : i32
    %c0_i32_1 = arith.constant 0 : i32
    return %c0_i32, %c0_i32_0 : i32, i32
  }
  func.func @transform_3(%arg0: i32) -> (i32, i32) {
    %c0_i32 = arith.constant 0 : i32
    %c0_i32_0 = arith.constant 0 : i32
    return %arg0, %c0_i32 : i32, i32
  }
  func.func @transform_4(%arg0: i32) -> (i32, i32) {
    %c0_i32 = arith.constant 0 : i32
    %c0_i32_0 = arith.constant 0 : i32
    %c0_i32_1 = arith.constant 0 : i32
    return %c0_i32, %c0_i32_0 : i32, i32
  }
  func.func @transform_5(%arg0: i32) -> (i32, i32) {
    %c0_i32 = arith.constant 0 : i32
    %c0_i32_0 = arith.constant 0 : i32
    %c0_i32_1 = arith.constant 0 : i32
    return %c0_i32, %c0_i32_0 : i32, i32
  }
  func.func @transform_6(%arg0: i32) -> (i32, i32) {
    %c0_i32 = arith.constant 0 : i32
    %c0_i32_0 = arith.constant 0 : i32
    return %arg0, %c0_i32 : i32, i32
  }
}

</mosaic_0001>

<bundles_post_ra>
// kernel: block_forward.2
= control target key start
LH: loop header
LB: loop body
LE: loop exit
PB: predicated region body
PF: predicated region fallthrough
CT: control target
= control target key end

     0   :  { %s499_s1 = inlined_call_operand.vmem [shape: bf16[128,128], index: 1, kind: input, shape index: {}]   ;;  %s500_s0 = inlined_call_operand.vmem [shape: bf16[128,128], index: 0, kind: input, shape index: {}]   ;;  %s501_s2 = inlined_call_operand.vmem [shape: f32[1,128], index: 2, kind: input, shape index: {}]   ;;  %s502_s3 = inlined_call_operand.vmem [shape: f32[128,128], index: 3, kind: output, shape index: {}]  }
   0x1   :  { %v364_v0 = vld [vmem:[%s499_s1 + $0x38] sm:$0xff]   ;;  %v365_v1 = vld [vmem:[%s499_s1 + $0x30] sm:$0xff]   ;;  %v366_v2 = vld [vmem:[%s499_s1 + $0x28] sm:$0xff]  }
   0x2   :  { %316 = vmatprep.subr.bf16.mxu0 %v364_v0  ;;  %348 = vmatprep.subr.bf16.mxu1 %v364_v0  ;;  %v367_v3 = vld [vmem:[%s499_s1 + $0x20] sm:$0xff]   ;;  %v368_v6 = vld [vmem:[%s499_s1 + $0x18] sm:$0xff]   ;;  %v369_v7 = vld [vmem:[%s499_s1 + $0x10] sm:$0xff]  }
   0x3   :  { %317 = vmatpush3.bf16.msra.mxu0 %v364_v0  ;;  %356 = vmatpush3.bf16.msra.mxu1 %v364_v0  ;;  %v372_v4 = vld [vmem:[%s500_s0] sm:$0xff]   ;;  %v370_v8 = vld [vmem:[%s499_s1 + $0x8] sm:$0xff]   ;;  %v376_v12 = vld [vmem:[%s500_s0 + $0x10] sm:$0xff]  }
   0x4   :  { %318 = vmatprep.subr.bf16.mxu0 %v365_v1  ;;  %349 = vmatprep.subr.bf16.mxu1 %v365_v1  ;;  %v373_v5 = vld [vmem:[%s500_s0 + $0x20] sm:$0xff]   ;;  %v374_v10 = vld [vmem:[%s500_s0 + $0x8] sm:$0xff]   ;;  %v377_v13 = vld [vmem:[%s500_s0 + $0x30] sm:$0xff]  }
   0x5   :  { %332 = vmatprep.mubr.bf16.mxu0 %v372_v4  ;;  %340 = vmatprep.mubr.bf16.mxu1 %v373_v5  ;;  %v371_v9 = vld [vmem:[%s499_s1] sm:$0xff]   ;;  %v375_v11 = vld [vmem:[%s500_s0 + $0x28] sm:$0xff]   ;;  %v378_v14 = vld [vmem:[%s500_s0 + $0x18] sm:$0xff]  }
   0x6   :  { %v379_v15 = vld [vmem:[%s500_s0 + $0x38] sm:$0xff]   ;;  %v283_v16 = vld [vmem:[%s501_s2] ss:$0 sm:$0xff] }
   0x7   :  { %319 = vmatpush3.bf16.msra.mxu0 %v365_v1  ;;  %357 = vmatpush3.bf16.msra.mxu1 %v365_v1 }
   0x8   :  { %320 = vmatprep.subr.bf16.mxu0 %v366_v2  ;;  %350 = vmatprep.subr.bf16.mxu1 %v366_v2 }
   0xb   :  { %321 = vmatpush3.bf16.msra.mxu0 %v366_v2  ;;  %358 = vmatpush3.bf16.msra.mxu1 %v366_v2 }
   0xc   :  { %322 = vmatprep.subr.bf16.mxu0 %v367_v3  ;;  %351 = vmatprep.subr.bf16.mxu1 %v367_v3 }
   0xf   :  { %323 = vmatpush3.bf16.msra.mxu0 %v367_v3  ;;  %359 = vmatpush3.bf16.msra.mxu1 %v367_v3 }
  0x10   :  { %324 = vmatprep.subr.bf16.mxu0 %v368_v6  ;;  %352 = vmatprep.subr.bf16.mxu1 %v368_v6 }
  0x13   :  { %325 = vmatpush3.bf16.msra.mxu0 %v368_v6  ;;  %360 = vmatpush3.bf16.msra.mxu1 %v368_v6 }
  0x14   :  { %326 = vmatprep.subr.bf16.mxu0 %v369_v7  ;;  %353 = vmatprep.subr.bf16.mxu1 %v369_v7 }
  0x17   :  { %327 = vmatpush3.bf16.msra.mxu0 %v369_v7  ;;  %361 = vmatpush3.bf16.msra.mxu1 %v369_v7 }
  0x18   :  { %328 = vmatprep.subr.bf16.mxu0 %v370_v8  ;;  %354 = vmatprep.subr.bf16.mxu1 %v370_v8 }
  0x1b   :  { %329 = vmatpush3.bf16.msra.mxu0 %v370_v8  ;;  %362 = vmatpush3.bf16.msra.mxu1 %v370_v8 }
  0x1c   :  { %330 = vmatprep.subr.bf16.mxu0 %v371_v9  ;;  %355 = vmatprep.subr.bf16.mxu1 %v371_v9 }
  0x1f   :  { %331 = vmatpush3.bf16.msra.mxu0 %v371_v9  ;;  %363 = vmatpush3.bf16.msra.mxu1 %v371_v9 }
  0x22   :  { %333 = vmatmul.mubr.bf16.vlgmr.msra.gmra.mxu0 %v374_v10  ;;  %341 = vmatmul.mubr.bf16.vlgmr.msra.gmra.mxu1 %v375_v11 }
  0x23   :  { %336 = vmatprep.mubr.bf16.mxu0 %v376_v12  ;;  %344 = vmatprep.mubr.bf16.mxu1 %v377_v13 }
  0x2a   :  { %337 = vmatmul.mubr.bf16.gmra.mxu0 %v378_v14  ;;  %345 = vmatmul.mubr.bf16.gmra.mxu1 %v379_v15 }
  0xe2   :  { %v334_v17 = vpop.f32.mrf.mxu0  ;;  %v342_v18 = vpop.f32.mrf.mxu1 }
  0xe3   :  { %v193_v19 = vadd.f32 %v334_v17, %v283_v16  ;;  %v225_v20 = vadd.f32 %v342_v18, %v283_v16 }
  0xe4   :  { %v184_v21 = vpop.f32.mrf.mxu0  ;;  %v216_v22 = vpop.f32.mrf.mxu1 }
  0xe5   :  { %v249_v23 = vmax.f32 %v193_v19, 0.0  ;;  %v257_v24 = vmax.f32 %v225_v20, 0.0  ;;  %v185_v25 = vadd.f32 %v283_v16, %v184_v21  ;;  %v217_v26 = vadd.f32 %v283_v16, %v216_v22 }
  0xe6   :  { %v335_v27 = vpop.f32.mrf.mxu0  ;;  %v343_v28 = vpop.f32.mrf.mxu1 }
  0xe7   :  { %265 = vst [vmem:[%s502_s3 + $0x10] sm:$0xff] %v249_v23  ;;  %273 = vst [vmem:[%s502_s3 + $0x50] sm:$0xff] %v257_v24  ;;  %v247_v29 = vmax.f32 %v185_v25, 0.0  ;;  %v255_v30 = vmax.f32 %v217_v26, 0.0  ;;  %v196_v31 = vadd.f32 %v335_v27, %v283_v16  ;;  %v228_v32 = vadd.f32 %v343_v28, %v283_v16 }
  0xe8   :  { %v187_v33 = vpop.f32.mrf.mxu0  ;;  %v219_v34 = vpop.f32.mrf.mxu1 }
  0xe9   :  { %263 = vst [vmem:[%s502_s3] sm:$0xff] %v247_v29  ;;  %271 = vst [vmem:[%s502_s3 + $0x40] sm:$0xff] %v255_v30  ;;  %v250_v35 = vmax.f32 %v196_v31, 0.0  ;;  %v258_v36 = vmax.f32 %v228_v32, 0.0  ;;  %v188_v37 = vadd.f32 %v283_v16, %v187_v33  ;;  %v220_v38 = vadd.f32 %v283_v16, %v219_v34 }
  0xea   :  { %v338_v39 = vpop.f32.mrf.mxu0  ;;  %v346_v40 = vpop.f32.mrf.mxu1 }
  0xeb   :  { %266 = vst [vmem:[%s502_s3 + $0x18] sm:$0xff] %v250_v35  ;;  %274 = vst [vmem:[%s502_s3 + $0x58] sm:$0xff] %v258_v36  ;;  %v248_v41 = vmax.f32 %v188_v37, 0.0  ;;  %v256_v42 = vmax.f32 %v220_v38, 0.0  ;;  %v209_v43 = vadd.f32 %v338_v39, %v283_v16  ;;  %v241_v44 = vadd.f32 %v346_v40, %v283_v16 }
  0xec   :  { %v200_v45 = vpop.f32.mrf.mxu0  ;;  %v232_v46 = vpop.f32.mrf.mxu1 }
  0xed   :  { %264 = vst [vmem:[%s502_s3 + $0x8] sm:$0xff] %v248_v41  ;;  %272 = vst [vmem:[%s502_s3 + $0x48] sm:$0xff] %v256_v42  ;;  %v253_v47 = vmax.f32 %v209_v43, 0.0  ;;  %v261_v48 = vmax.f32 %v241_v44, 0.0  ;;  %v201_v49 = vadd.f32 %v283_v16, %v200_v45  ;;  %v233_v50 = vadd.f32 %v283_v16, %v232_v46 }
  0xee   :  { %v339_v51 = vpop.f32.mrf.mxu0  ;;  %v347_v52 = vpop.f32.mrf.mxu1 }
  0xef   :  { %269 = vst [vmem:[%s502_s3 + $0x30] sm:$0xff] %v253_v47  ;;  %277 = vst [vmem:[%s502_s3 + $0x70] sm:$0xff] %v261_v48  ;;  %v251_v53 = vmax.f32 %v201_v49, 0.0  ;;  %v259_v54 = vmax.f32 %v233_v50, 0.0  ;;  %v212_v55 = vadd.f32 %v339_v51, %v283_v16  ;;  %v244_v56 = vadd.f32 %v347_v52, %v283_v16 }
  0xf0   :  { %v203_v57 = vpop.f32.mrf.mxu0  ;;  %v235_v58 = vpop.f32.mrf.mxu1 }
  0xf1   :  { %267 = vst [vmem:[%s502_s3 + $0x20] sm:$0xff] %v251_v53  ;;  %275 = vst [vmem:[%s502_s3 + $0x60] sm:$0xff] %v259_v54  ;;  %v254_v59 = vmax.f32 %v212_v55, 0.0  ;;  %v262_v60 = vmax.f32 %v244_v56, 0.0  ;;  %v204_v61 = vadd.f32 %v283_v16, %v203_v57  ;;  %v236_v62 = vadd.f32 %v283_v16, %v235_v58 }
  0xf3   :  { %270 = vst [vmem:[%s502_s3 + $0x38] sm:$0xff] %v254_v59  ;;  %278 = vst [vmem:[%s502_s3 + $0x78] sm:$0xff] %v262_v60  ;;  %v252_v63 = vmax.f32 %v204_v61, 0.0  ;;  %v260_v0 = vmax.f32 %v236_v62, 0.0 }
  0xf5   :  { %268 = vst [vmem:[%s502_s3 + $0x28] sm:$0xff] %v252_v63  ;;  %276 = vst [vmem:[%s502_s3 + $0x68] sm:$0xff] %v260_v0 }

// kernel: block_forward.3
= control target key start
LH: loop header
LB: loop body
LE: loop exit
PB: predicated region body
PF: predicated region fallthrough
CT: control target
= control target key end

     0   :  { %s923_s1 = inlined_call_operand.vmem [shape: bf16[128,128], index: 1, kind: input, shape index: {}]   ;;  %s924_s4 = inlined_call_operand.vmem [shape: bf16[128,128], index: 4, kind: input, shape index: {}]   ;;  %s925_s0 = inlined_call_operand.vmem [shape: bf16[128,128], index: 0, kind: input, shape index: {}]   ;;  %s926_s3 = inlined_call_operand.vmem [shape: bf16[128,128], index: 3, kind: input, shape index: {}]   ;;  %s927_s2 = inlined_call_operand.vmem [shape: f32[1,128], index: 2, kind: input, shape index: {}]   ;;  %s928_s5 = inlined_call_operand.vmem [shape: f32[1,128], index: 5, kind: input, shape index: {}]   ;;  %s929_s6 = inlined_call_operand.vmem [shape: f32[128,128], index: 6, kind: output, shape index: {}]  }
   0x1   :  { %v670_v0 = vld [vmem:[%s923_s1 + $0x38] sm:$0xff]   ;;  %v672_v2 = vld [vmem:[%s923_s1 + $0x30] sm:$0xff]   ;;  %v674_v4 = vld [vmem:[%s923_s1 + $0x28] sm:$0xff]  }
   0x2   :  { %v671_v1 = vld [vmem:[%s924_s4 + $0x38] sm:$0xff]   ;;  %606 = vmatprep.subr.bf16.mxu0 %v670_v0  ;;  %v673_v3 = vld [vmem:[%s924_s4 + $0x30] sm:$0xff]   ;;  %v675_v5 = vld [vmem:[%s924_s4 + $0x28] sm:$0xff]  }
   0x3   :  { %638 = vmatprep.subr.bf16.mxu1 %v671_v1  ;;  %607 = vmatpush3.bf16.msra.mxu0 %v670_v0  ;;  %v676_v6 = vld [vmem:[%s923_s1 + $0x20] sm:$0xff]   ;;  %v678_v8 = vld [vmem:[%s923_s1 + $0x18] sm:$0xff]   ;;  %v680_v10 = vld [vmem:[%s923_s1 + $0x10] sm:$0xff]  }
   0x4   :  { %639 = vmatpush3.bf16.msra.mxu1 %v671_v1  ;;  %608 = vmatprep.subr.bf16.mxu0 %v672_v2  ;;  %v677_v7 = vld [vmem:[%s924_s4 + $0x20] sm:$0xff]   ;;  %v679_v9 = vld [vmem:[%s924_s4 + $0x18] sm:$0xff]   ;;  %v681_v11 = vld [vmem:[%s924_s4 + $0x10] sm:$0xff]  }
   0x5   :  { %640 = vmatprep.subr.bf16.mxu1 %v673_v3  ;;  %v686_v12 = vld [vmem:[%s925_s0] sm:$0xff]   ;;  %v682_v14 = vld [vmem:[%s923_s1 + $0x8] sm:$0xff]   ;;  %v690_v20 = vld [vmem:[%s925_s0 + $0x10] sm:$0xff]  }
   0x6   :  { %v687_v13 = vld [vmem:[%s926_s3] sm:$0xff]   ;;  %622 = vmatprep.mubr.bf16.mxu0 %v686_v12  ;;  %v683_v15 = vld [vmem:[%s924_s4 + $0x8] sm:$0xff]   ;;  %v691_v21 = vld [vmem:[%s926_s3 + $0x10] sm:$0xff]  }
   0x7   :  { %609 = vmatpush3.bf16.msra.mxu0 %v672_v2  ;;  %654 = vmatprep.mubr.bf16.mxu1 %v687_v13  ;;  %v684_v16 = vld [vmem:[%s923_s1] sm:$0xff]   ;;  %v688_v18 = vld [vmem:[%s925_s0 + $0x8] sm:$0xff]   ;;  %v692_v22 = vld [vmem:[%s925_s0 + $0x18] sm:$0xff]  }
   0x8   :  { %641 = vmatpush3.bf16.msra.mxu1 %v673_v3  ;;  %610 = vmatprep.subr.bf16.mxu0 %v674_v4  ;;  %v685_v17 = vld [vmem:[%s924_s4] sm:$0xff]   ;;  %v689_v19 = vld [vmem:[%s926_s3 + $0x8] sm:$0xff]   ;;  %v693_v23 = vld [vmem:[%s926_s3 + $0x18] sm:$0xff]  }
   0x9   :  { %642 = vmatprep.subr.bf16.mxu1 %v675_v5  ;;  %v694_v24 = vld [vmem:[%s925_s0 + $0x20] sm:$0xff]   ;;  %v696_v26 = vld [vmem:[%s925_s0 + $0x28] sm:$0xff]   ;;  %v698_v28 = vld [vmem:[%s925_s0 + $0x30] sm:$0xff]  }
   0xa   :  { %v695_v25 = vld [vmem:[%s926_s3 + $0x20] sm:$0xff]   ;;  %v697_v27 = vld [vmem:[%s926_s3 + $0x28] sm:$0xff]   ;;  %v699_v29 = vld [vmem:[%s926_s3 + $0x30] sm:$0xff]  }
   0xb   :  { %611 = vmatpush3.bf16.msra.mxu0 %v674_v4  ;;  %v700_v30 = vld [vmem:[%s925_s0 + $0x38] sm:$0xff]   ;;  %v836_v32 = vld [vmem:[%s927_s2] ss:$0 sm:$0xff] }
   0xc   :  { %643 = vmatpush3.bf16.msra.mxu1 %v675_v5  ;;  %612 = vmatprep.subr.bf16.mxu0 %v676_v6  ;;  %v701_v31 = vld [vmem:[%s926_s3 + $0x38] sm:$0xff]   ;;  %v841_v33 = vld [vmem:[%s928_s5] ss:$0 sm:$0xff] }
   0xd   :  { %644 = vmatprep.subr.bf16.mxu1 %v677_v7 }
   0xf   :  { %613 = vmatpush3.bf16.msra.mxu0 %v676_v6 }
  0x10   :  { %645 = vmatpush3.bf16.msra.mxu1 %v677_v7  ;;  %614 = vmatprep.subr.bf16.mxu0 %v678_v8 }
  0x11   :  { %646 = vmatprep.subr.bf16.mxu1 %v679_v9 }
  0x13   :  { %615 = vmatpush3.bf16.msra.mxu0 %v678_v8 }
  0x14   :  { %647 = vmatpush3.bf16.msra.mxu1 %v679_v9  ;;  %616 = vmatprep.subr.bf16.mxu0 %v680_v10 }
  0x15   :  { %648 = vmatprep.subr.bf16.mxu1 %v681_v11 }
  0x17   :  { %617 = vmatpush3.bf16.msra.mxu0 %v680_v10 }
  0x18   :  { %649 = vmatpush3.bf16.msra.mxu1 %v681_v11  ;;  %618 = vmatprep.subr.bf16.mxu0 %v682_v14 }
  0x19   :  { %650 = vmatprep.subr.bf16.mxu1 %v683_v15 }
  0x1b   :  { %619 = vmatpush3.bf16.msra.mxu0 %v682_v14 }
  0x1c   :  { %651 = vmatpush3.bf16.msra.mxu1 %v683_v15  ;;  %620 = vmatprep.subr.bf16.mxu0 %v684_v16 }
  0x1d   :  { %652 = vmatprep.subr.bf16.mxu1 %v685_v17 }
  0x1f   :  { %621 = vmatpush3.bf16.msra.mxu0 %v684_v16 }
  0x20   :  { %653 = vmatpush3.bf16.msra.mxu1 %v685_v17 }
  0x22   :  { %623 = vmatmul.mubr.bf16.vlgmr.msra.gmra.mxu0 %v688_v18 }
  0x23   :  { %655 = vmatmul.mubr.bf16.vlgmr.msra.gmra.mxu1 %v689_v19  ;;  %626 = vmatprep.mubr.bf16.mxu0 %v690_v20 }
  0x24   :  { %658 = vmatprep.mubr.bf16.mxu1 %v691_v21 }
  0x2a   :  { %627 = vmatmul.mubr.bf16.gmra.mxu0 %v692_v22 }
  0x2b   :  { %659 = vmatmul.mubr.bf16.gmra.mxu1 %v693_v23  ;;  %630 = vmatprep.mubr.bf16.mxu0 %v694_v24 }
  0x2c   :  { %662 = vmatprep.mubr.bf16.mxu1 %v695_v25 }
  0x32   :  { %631 = vmatmul.mubr.bf16.gmra.mxu0 %v696_v26 }
  0x33   :  { %663 = vmatmul.mubr.bf16.gmra.mxu1 %v697_v27  ;;  %634 = vmatprep.mubr.bf16.mxu0 %v698_v28 }
  0x34   :  { %666 = vmatprep.mubr.bf16.mxu1 %v699_v29 }
  0x3a   :  { %635 = vmatmul.mubr.bf16.gmra.mxu0 %v700_v30 }
  0x3b   :  { %667 = vmatmul.mubr.bf16.gmra.mxu1 %v701_v31 }
  0xe2   :  { %v624_v34 = vpop.f32.mrf.mxu0 }
  0xe3   :  { %v202_v35 = vadd.f32 %v624_v34, %v836_v32  ;;  %v656_v36 = vpop.f32.mrf.mxu1 }
  0xe4   :  { %v434_v37 = vadd.f32 %v656_v36, %v841_v33  ;;  %v193_v38 = vpop.f32.mrf.mxu0 }
  0xe5   :  { %v194_v39 = vadd.f32 %v836_v32, %v193_v38  ;;  %v425_v40 = vpop.f32.mrf.mxu1 }
  0xe6   :  { %v490_v41 = vadd.f32 %v434_v37, %v202_v35  ;;  %v426_v42 = vadd.f32 %v841_v33, %v425_v40  ;;  %v625_v43 = vpop.f32.mrf.mxu0 }
  0xe7   :  { %v205_v44 = vadd.f32 %v625_v43, %v836_v32  ;;  %v657_v45 = vpop.f32.mrf.mxu1 }
  0xe8   :  { %v506_v46 = vmax.f32 %v490_v41, 0.0  ;;  %v488_v47 = vadd.f32 %v426_v42, %v194_v39  ;;  %v437_v48 = vadd.f32 %v657_v45, %v841_v33  ;;  %v196_v49 = vpop.f32.mrf.mxu0 }
  0xe9   :  { %v197_v50 = vadd.f32 %v836_v32, %v196_v49  ;;  %v428_v51 = vpop.f32.mrf.mxu1 }
  0xea   :  { %522 = vst [vmem:[%s929_s6 + $0x10] sm:$0xff] %v506_v46  ;;  %v504_v52 = vmax.f32 %v488_v47, 0.0  ;;  %v491_v53 = vadd.f32 %v437_v48, %v205_v44  ;;  %v429_v54 = vadd.f32 %v841_v33, %v428_v51  ;;  %v628_v55 = vpop.f32.mrf.mxu0 }
  0xeb   :  { %v218_v56 = vadd.f32 %v628_v55, %v836_v32  ;;  %v660_v57 = vpop.f32.mrf.mxu1 }
  0xec   :  { %520 = vst [vmem:[%s929_s6] sm:$0xff] %v504_v52  ;;  %v507_v58 = vmax.f32 %v491_v53, 0.0  ;;  %v489_v59 = vadd.f32 %v429_v54, %v197_v50  ;;  %v450_v60 = vadd.f32 %v660_v57, %v841_v33  ;;  %v209_v61 = vpop.f32.mrf.mxu0 }
  0xed   :  { %v210_v62 = vadd.f32 %v836_v32, %v209_v61  ;;  %v441_v63 = vpop.f32.mrf.mxu1 }
  0xee   :  { %523 = vst [vmem:[%s929_s6 + $0x18] sm:$0xff] %v507_v58  ;;  %v505_v0 = vmax.f32 %v489_v59, 0.0  ;;  %v494_v1 = vadd.f32 %v450_v60, %v218_v56  ;;  %v442_v2 = vadd.f32 %v841_v33, %v441_v63  ;;  %v629_v3 = vpop.f32.mrf.mxu0 }
  0xef   :  { %v221_v4 = vadd.f32 %v629_v3, %v836_v32  ;;  %v661_v5 = vpop.f32.mrf.mxu1 }
  0xf0   :  { %521 = vst [vmem:[%s929_s6 + $0x8] sm:$0xff] %v505_v0  ;;  %v510_v6 = vmax.f32 %v494_v1, 0.0  ;;  %v492_v7 = vadd.f32 %v442_v2, %v210_v62  ;;  %v453_v8 = vadd.f32 %v661_v5, %v841_v33  ;;  %v212_v9 = vpop.f32.mrf.mxu0 }
  0xf1   :  { %v213_v10 = vadd.f32 %v836_v32, %v212_v9  ;;  %v444_v11 = vpop.f32.mrf.mxu1 }
  0xf2   :  { %526 = vst [vmem:[%s929_s6 + $0x30] sm:$0xff] %v510_v6  ;;  %v508_v12 = vmax.f32 %v492_v7, 0.0  ;;  %v495_v13 = vadd.f32 %v453_v8, %v221_v4  ;;  %v445_v14 = vadd.f32 %v841_v33, %v444_v11  ;;  %v632_v15 = vpop.f32.mrf.mxu0 }
  0xf3   :  { %v234_v16 = vadd.f32 %v632_v15, %v836_v32  ;;  %v664_v17 = vpop.f32.mrf.mxu1 }
  0xf4   :  { %524 = vst [vmem:[%s929_s6 + $0x20] sm:$0xff] %v508_v12  ;;  %v511_v18 = vmax.f32 %v495_v13, 0.0  ;;  %v493_v19 = vadd.f32 %v445_v14, %v213_v10  ;;  %v466_v20 = vadd.f32 %v664_v17, %v841_v33  ;;  %v225_v21 = vpop.f32.mrf.mxu0 }
  0xf5   :  { %v226_v22 = vadd.f32 %v836_v32, %v225_v21  ;;  %v457_v23 = vpop.f32.mrf.mxu1 }
  0xf6   :  { %527 = vst [vmem:[%s929_s6 + $0x38] sm:$0xff] %v511_v18  ;;  %v509_v24 = vmax.f32 %v493_v19, 0.0  ;;  %v498_v25 = vadd.f32 %v466_v20, %v234_v16  ;;  %v458_v26 = vadd.f32 %v841_v33, %v457_v23  ;;  %v633_v27 = vpop.f32.mrf.mxu0 }
  0xf7   :  { %v237_v28 = vadd.f32 %v633_v27, %v836_v32  ;;  %v665_v29 = vpop.f32.mrf.mxu1 }
  0xf8   :  { %525 = vst [vmem:[%s929_s6 + $0x28] sm:$0xff] %v509_v24  ;;  %v514_v30 = vmax.f32 %v498_v25, 0.0  ;;  %v496_v31 = vadd.f32 %v458_v26, %v226_v22  ;;  %v469_v34 = vadd.f32 %v665_v29, %v841_v33  ;;  %v228_v35 = vpop.f32.mrf.mxu0 }
  0xf9   :  { %v229_v36 = vadd.f32 %v836_v32, %v228_v35  ;;  %v460_v37 = vpop.f32.mrf.mxu1 }
  0xfa   :  { %530 = vst [vmem:[%s929_s6 + $0x50] sm:$0xff] %v514_v30  ;;  %v512_v38 = vmax.f32 %v496_v31, 0.0  ;;  %v499_v39 = vadd.f32 %v469_v34, %v237_v28  ;;  %v461_v40 = vadd.f32 %v841_v33, %v460_v37  ;;  %v636_v41 = vpop.f32.mrf.mxu0 }
  0xfb   :  { %v250_v42 = vadd.f32 %v636_v41, %v836_v32  ;;  %v668_v43 = vpop.f32.mrf.mxu1 }
  0xfc   :  { %528 = vst [vmem:[%s929_s6 + $0x40] sm:$0xff] %v512_v38  ;;  %v515_v44 = vmax.f32 %v499_v39, 0.0  ;;  %v497_v45 = vadd.f32 %v461_v40, %v229_v36  ;;  %v482_v46 = vadd.f32 %v668_v43, %v841_v33  ;;  %v241_v47 = vpop.f32.mrf.mxu0 }
  0xfd   :  { %v242_v48 = vadd.f32 %v836_v32, %v241_v47  ;;  %v473_v49 = vpop.f32.mrf.mxu1 }
  0xfe   :  { %531 = vst [vmem:[%s929_s6 + $0x58] sm:$0xff] %v515_v44  ;;  %v513_v50 = vmax.f32 %v497_v45, 0.0  ;;  %v502_v51 = vadd.f32 %v482_v46, %v250_v42  ;;  %v474_v52 = vadd.f32 %v841_v33, %v473_v49  ;;  %v637_v53 = vpop.f32.mrf.mxu0 }
  0xff   :  { %v253_v54 = vadd.f32 %v637_v53, %v836_v32  ;;  %v669_v55 = vpop.f32.mrf.mxu1 }
 0x100   :  { %529 = vst [vmem:[%s929_s6 + $0x48] sm:$0xff] %v513_v50  ;;  %v518_v56 = vmax.f32 %v502_v51, 0.0  ;;  %v500_v57 = vadd.f32 %v474_v52, %v242_v48  ;;  %v485_v58 = vadd.f32 %v669_v55, %v841_v33  ;;  %v244_v59 = vpop.f32.mrf.mxu0 }
 0x101   :  { %v245_v60 = vadd.f32 %v836_v32, %v244_v59  ;;  %v476_v61 = vpop.f32.mrf.mxu1 }
 0x102   :  { %534 = vst [vmem:[%s929_s6 + $0x70] sm:$0xff] %v518_v56  ;;  %v516_v62 = vmax.f32 %v500_v57, 0.0  ;;  %v503_v63 = vadd.f32 %v485_v58, %v253_v54  ;;  %v477_v0 = vadd.f32 %v841_v33, %v476_v61 }
 0x104   :  { %532 = vst [vmem:[%s929_s6 + $0x60] sm:$0xff] %v516_v62  ;;  %v519_v1 = vmax.f32 %v503_v63, 0.0  ;;  %v501_v2 = vadd.f32 %v477_v0, %v245_v60 }
 0x106   :  { %535 = vst [vmem:[%s929_s6 + $0x78] sm:$0xff] %v519_v1  ;;  %v517_v32 = vmax.f32 %v501_v2, 0.0 }
 0x108   :  { %533 = vst [vmem:[%s929_s6 + $0x68] sm:$0xff] %v517_v32 }

</bundles_post_ra>
